<compile_context>
chip_gen: v6e
topology: v6e:2x2x1
jax: 0.10.0
libtpu: 0.0.40
codegen_flags: <defaults>
</compile_context>

<pallas_src>
import jax
import jax.numpy as jnp
from jax import lax
from jax.experimental import pallas as pl
from jax.experimental.pallas import tpu as pltpu


def _mlp_kernel(x_ref, w1_ref, b1_ref, w2_ref, b2_ref, w3_ref, b3_ref, o_ref):
    x = x_ref[...]                                                   # (tm, D) f32
    # Layer 1: matmul (f32 accumulate) + bias + ReLU on the VPU.
    h1 = jnp.dot(x, w1_ref[...], preferred_element_type=jnp.float32) + b1_ref[...]
    h1 = jnp.maximum(h1, 0.0)                                        # (tm, H1)
    # Dropout(p=0.3) is identity in inference mode.
    # Layer 2.
    h2 = jnp.dot(h1, w2_ref[...], preferred_element_type=jnp.float32) + b2_ref[...]
    h2 = jnp.maximum(h2, 0.0)                                        # (tm, H2)
    # Layer 3 (H2 -> 1): contract the (1, H2) weight row against h2's feature
    # axis so the result is a lane-dense (1, tm) row — no N=1 output column and
    # no masked partial store on writeback.
    out_row = lax.dot_general(
        w3_ref[...], h2,
        dimension_numbers=(((1,), (1,)), ((), ())),
        preferred_element_type=jnp.float32,
    ) + b3_ref[...]                                                  # (1, tm)
    o_ref[...] = out_row.astype(o_ref.dtype)


def _choose_tm(B, cap=8192):
    """Largest 128-aligned row tile (<= cap) giving an EVEN grid of >= 2 steps.

    Bigger tiles amortize the ~0.35 us per-grid-step overhead (the dominant
    cost at these shapes); an even step count keeps both v7x TensorCores busy.
    Falls back to a single full-array block when B is not 128-aligned.
    """
    t = (min(cap, B // 2) // 128) * 128
    while t >= 128:
        if B % t == 0 and (B // t) % 2 == 0:
            return t
        t -= 128
    return B  # single-step fallback (full-array blocks; any B is legal here)


def income_regressor_forward(x, params, *, tm=None):
    """x: (B, D) float32.  params: kernel-ready dict (see init_params)."""
    B, D = x.shape
    if tm is None:
        tm = _choose_tm(B)
    assert B % tm == 0, "batch must be divisible by the row tile"
    # Lane-dense output block needs tm % 128 == 0 unless the block is the full
    # array (which also satisfies the x-tile sublane constraint).
    assert tm == B or tm % 128 == 0, "row tile must be a multiple of 128 (or == B)"

    w1, b1 = params["w1"], params["b1"]
    w2, b2 = params["w2"], params["b2"]
    w3, b3 = params["w3"], params["b3"]
    H1 = w1.shape[1]
    H2 = w2.shape[1]

    grid = (B // tm,)
    out_row = pl.pallas_call(
        _mlp_kernel,
        out_shape=jax.ShapeDtypeStruct((1, B), jnp.float32),
        grid_spec=pltpu.PrefetchScalarGridSpec(
            num_scalar_prefetch=0,
            grid=grid,
            in_specs=[
                pl.BlockSpec((tm, D), lambda i: (i, 0)),    # x tile (streamed f32)
                pl.BlockSpec((D, H1), lambda i: (0, 0)),    # w1 (resident)
                pl.BlockSpec((1, H1), lambda i: (0, 0)),    # b1
                pl.BlockSpec((H1, H2), lambda i: (0, 0)),   # w2
                pl.BlockSpec((1, H2), lambda i: (0, 0)),    # b2
                pl.BlockSpec((1, H2), lambda i: (0, 0)),    # w3 as a row
                pl.BlockSpec((1, 1), lambda i: (0, 0)),     # b3
            ],
            out_specs=pl.BlockSpec((1, tm), lambda i: (0, i)),  # lane-dense row
        ),
        compiler_params=pltpu.CompilerParams(
            dimension_semantics=("parallel",),
            vmem_limit_bytes=32 * 1024 * 1024,  # real footprint < 10 MiB even at tm=8192
        ),
    )(x, w1, b1, w2, b2, w3, b3)
    return out_row.reshape(B, 1)


def init_params(key, input_dim):
    """nn.Linear-style init, produced ONCE in kernel-ready layout:
    weights as [in, out] (transposed vs. nn.Linear's [out, in]), biases as
    (1, out), w3 as a (1, 32) row, b3 as (1, 1), all float32."""
    k1, k2, k3, k4, k5, k6 = jax.random.split(key, 6)

    def linear_init(kw, kb, fan_in, fan_out):
        bound = 1.0 / jnp.sqrt(float(fan_in))
        w = jax.random.uniform(kw, (fan_in, fan_out), jnp.float32, -bound, bound)
        b = jax.random.uniform(kb, (1, fan_out), jnp.float32, -bound, bound)
        return w, b

    w1, b1 = linear_init(k1, k2, input_dim, 64)
    w2, b2 = linear_init(k3, k4, 64, 32)
    w3, b3 = linear_init(k5, k6, 32, 1)
    return {
        "w1": w1, "b1": b1,
        "w2": w2, "b2": b2,
        "w3": w3.reshape(1, 32),   # row layout for the lane-dense final projection
        "b3": b3.reshape(1, 1),
    }


def _reference_f32(x, p):
    """Pure-JAX f32 reference with the original module semantics."""
    h1 = jnp.maximum(x @ p["w1"] + p["b1"], 0.0)
    h2 = jnp.maximum(h1 @ p["w2"] + p["b2"], 0.0)
    return h2 @ p["w3"].T + p["b3"]


if __name__ == "__main__":
    key = jax.random.PRNGKey(0)
    kx, kp = jax.random.split(key)

    batch, input_dim = 512, 16       # small tabular batch; tm=256 -> 2-step even grid
    x = jax.random.normal(kx, (batch, input_dim), dtype=jnp.float32)
    params = init_params(kp, input_dim)

    out = jax.block_until_ready(income_regressor_forward(x, params))

    ref = _reference_f32(x, params)
    assert out.shape == (batch, 1)
    assert jnp.allclose(out, ref, atol=2e-3, rtol=2e-3), float(jnp.max(jnp.abs(out - ref)))
    print("KERNEL_OK")
</pallas_src>

<mosaic_0001>
module attributes {stable_mosaic.version = 11 : i64} {
  func.func @_mlp_kernel(%arg0: i32, %arg1: memref<256x16xf32, #tpu.memory_space<vmem>>, %arg2: memref<16x64xf32, #tpu.memory_space<vmem>>, %arg3: memref<1x64xf32, #tpu.memory_space<vmem>>, %arg4: memref<64x32xf32, #tpu.memory_space<vmem>>, %arg5: memref<1x32xf32, #tpu.memory_space<vmem>>, %arg6: memref<1x32xf32, #tpu.memory_space<vmem>>, %arg7: memref<1x1xf32, #tpu.memory_space<vmem>>, %arg8: memref<1x256xf32, #tpu.memory_space<vmem>>) attributes {dimension_semantics = [#tpu.dimension_semantics<parallel>], iteration_bounds = array<i64: 2>, scalar_prefetch = 0 : i64, scratch_operands = 0 : i64, tpu.core_type = #tpu.core_type<tc>, window_params = [{transform_indices = @transform_0, window_bounds = array<i64: 256, 16>}, {pipeline_mode = #tpu.pipeline_mode<synchronous>, transform_indices = @transform_1, window_bounds = array<i64: 16, 64>}, {pipeline_mode = #tpu.pipeline_mode<synchronous>, transform_indices = @transform_2, window_bounds = array<i64: 1, 64>}, {pipeline_mode = #tpu.pipeline_mode<synchronous>, transform_indices = @transform_3, window_bounds = array<i64: 64, 32>}, {pipeline_mode = #tpu.pipeline_mode<synchronous>, transform_indices = @transform_4, window_bounds = array<i64: 1, 32>}, {pipeline_mode = #tpu.pipeline_mode<synchronous>, transform_indices = @transform_5, window_bounds = array<i64: 1, 32>}, {pipeline_mode = #tpu.pipeline_mode<synchronous>, transform_indices = @transform_6, window_bounds = array<i64: 1, 1>}, {transform_indices = @transform_7, window_bounds = array<i64: 1, 256>}]} {
    %c0 = arith.constant 0 : index
    %c0_0 = arith.constant 0 : index
    %0 = vector.load %arg1[%c0, %c0_0] : memref<256x16xf32, #tpu.memory_space<vmem>>, vector<256x16xf32>
    %c0_1 = arith.constant 0 : index
    %c0_2 = arith.constant 0 : index
    %1 = vector.load %arg2[%c0_1, %c0_2] : memref<16x64xf32, #tpu.memory_space<vmem>>, vector<16x64xf32>
    %cst = arith.constant dense<0.000000e+00> : vector<256x64xf32>
    %2 = tpu.matmul %0, %1, %cst {dimension_numbers = #tpu.dot_dimension_numbers<[1], [0], [0], [1], [0, 0, 1, 1], [], []>} : vector<256x16xf32>, vector<16x64xf32>, vector<256x64xf32> -> vector<256x64xf32>
    %c0_3 = arith.constant 0 : index
    %c0_4 = arith.constant 0 : index
    %3 = vector.load %arg3[%c0_3, %c0_4] : memref<1x64xf32, #tpu.memory_space<vmem>>, vector<1x64xf32>
    %4 = vector.broadcast %3 : vector<1x64xf32> to vector<256x64xf32>
    %5 = arith.addf %2, %4 : vector<256x64xf32>
    %cst_5 = arith.constant 0.000000e+00 : f32
    %6 = vector.broadcast %cst_5 : f32 to vector<256x64xf32>
    %7 = arith.maximumf %5, %6 : vector<256x64xf32>
    %c0_6 = arith.constant 0 : index
    %c0_7 = arith.constant 0 : index
    %8 = vector.load %arg4[%c0_6, %c0_7] : memref<64x32xf32, #tpu.memory_space<vmem>>, vector<64x32xf32>
    %cst_8 = arith.constant dense<0.000000e+00> : vector<256x32xf32>
    %9 = tpu.matmul %7, %8, %cst_8 {dimension_numbers = #tpu.dot_dimension_numbers<[1], [0], [0], [1], [0, 0, 1, 1], [], []>} : vector<256x64xf32>, vector<64x32xf32>, vector<256x32xf32> -> vector<256x32xf32>
    %c0_9 = arith.constant 0 : index
    %c0_10 = arith.constant 0 : index
    %10 = vector.load %arg5[%c0_9, %c0_10] : memref<1x32xf32, #tpu.memory_space<vmem>>, vector<1x32xf32>
    %11 = vector.broadcast %10 : vector<1x32xf32> to vector<256x32xf32>
    %12 = arith.addf %9, %11 : vector<256x32xf32>
    %cst_11 = arith.constant 0.000000e+00 : f32
    %13 = vector.broadcast %cst_11 : f32 to vector<256x32xf32>
    %14 = arith.maximumf %12, %13 : vector<256x32xf32>
    %c0_12 = arith.constant 0 : index
    %c0_13 = arith.constant 0 : index
    %15 = vector.load %arg6[%c0_12, %c0_13] : memref<1x32xf32, #tpu.memory_space<vmem>>, vector<1x32xf32>
    %cst_14 = arith.constant dense<0.000000e+00> : vector<1x256xf32>
    %16 = tpu.matmul %15, %14, %cst_14 {dimension_numbers = #tpu.dot_dimension_numbers<[1], [1], [0], [0], [0, 0, 1, 0], [], []>} : vector<1x32xf32>, vector<256x32xf32>, vector<1x256xf32> -> vector<1x256xf32>
    %c0_15 = arith.constant 0 : index
    %c0_16 = arith.constant 0 : index
    %17 = vector.load %arg7[%c0_15, %c0_16] : memref<1x1xf32, #tpu.memory_space<vmem>>, vector<1x1xf32>
    %18 = vector.broadcast %17 : vector<1x1xf32> to vector<1x256xf32>
    %19 = arith.addf %16, %18 : vector<1x256xf32>
    %c0_17 = arith.constant 0 : index
    %c0_18 = arith.constant 0 : index
    %20 = vector.load %arg8[%c0_17, %c0_18] : memref<1x256xf32, #tpu.memory_space<vmem>>, vector<1x256xf32>
    tpu.vector_store %arg8[%c0_17, %c0_18], %19 {strides = array<i32>} : memref<1x256xf32, #tpu.memory_space<vmem>>, vector<1x256xf32>,
    return
  }
  func.func @transform_0(%arg0: i32) -> (i32, i32) {
    %c0_i32 = arith.constant 0 : i32
    %c0_i32_0 = arith.constant 0 : i32
    return %arg0, %c0_i32 : i32, i32
  }
  func.func @transform_1(%arg0: i32) -> (i32, i32) {
    %c0_i32 = arith.constant 0 : i32
    %c0_i32_0 = arith.constant 0 : i32
    %c0_i32_1 = arith.constant 0 : i32
    return %c0_i32, %c0_i32_0 : i32, i32
  }
  func.func @transform_2(%arg0: i32) -> (i32, i32) {
    %c0_i32 = arith.constant 0 : i32
    %c0_i32_0 = arith.constant 0 : i32
    %c0_i32_1 = arith.constant 0 : i32
    return %c0_i32, %c0_i32_0 : i32, i32
  }
  func.func @transform_3(%arg0: i32) -> (i32, i32) {
    %c0_i32 = arith.constant 0 : i32
    %c0_i32_0 = arith.constant 0 : i32
    %c0_i32_1 = arith.constant 0 : i32
    return %c0_i32, %c0_i32_0 : i32, i32
  }
  func.func @transform_4(%arg0: i32) -> (i32, i32) {
    %c0_i32 = arith.constant 0 : i32
    %c0_i32_0 = arith.constant 0 : i32
    %c0_i32_1 = arith.constant 0 : i32
    return %c0_i32, %c0_i32_0 : i32, i32
  }
  func.func @transform_5(%arg0: i32) -> (i32, i32) {
    %c0_i32 = arith.constant 0 : i32
    %c0_i32_0 = arith.constant 0 : i32
    %c0_i32_1 = arith.constant 0 : i32
    return %c0_i32, %c0_i32_0 : i32, i32
  }
  func.func @transform_6(%arg0: i32) -> (i32, i32) {
    %c0_i32 = arith.constant 0 : i32
    %c0_i32_0 = arith.constant 0 : i32
    %c0_i32_1 = arith.constant 0 : i32
    return %c0_i32, %c0_i32_0 : i32, i32
  }
  func.func @transform_7(%arg0: i32) -> (i32, i32) {
    %c0_i32 = arith.constant 0 : i32
    %c0_i32_0 = arith.constant 0 : i32
    return %c0_i32, %arg0 : i32, i32
  }
}

</mosaic_0001>

<bundles_post_ra>
// kernel: tpu_custom_call.1
= control target key start
LH: loop header
LB: loop body
LE: loop exit
PB: predicated region body
PF: predicated region fallthrough
CT: control target
= control target key end

     0   :  { %s2185_s0 = inlined_call_operand.vmem [shape: f32[512,16], index: 0, kind: input, shape index: {}]   ;;  %s2186_s1 = inlined_call_operand.vmem [shape: f32[16,64], index: 1, kind: input, shape index: {}]   ;;  %s2187_s2 = inlined_call_operand.vmem [shape: f32[1,64], index: 2, kind: input, shape index: {}]   ;;  %s2188_s3 = inlined_call_operand.vmem [shape: f32[64,32], index: 3, kind: input, shape index: {}]   ;;  %s2189_s4 = inlined_call_operand.vmem [shape: f32[1,32], index: 4, kind: input, shape index: {}]   ;;  %s2190_s5 = inlined_call_operand.vmem [shape: f32[1,32], index: 5, kind: input, shape index: {}]   ;;  %s2191_s6 = inlined_call_operand.<no memory space> [shape: f32[1,1], index: 6, kind: input, shape index: {}]   ;;  %s2192_s7 = inlined_call_operand.hbm [shape: f32[1,512], index: 7, kind: output, shape index: {}]  }
   0x1   :  { %v12_v0 = vstv %s2191_s6 }
   0x2   :  { %13 = vst [vmem:[#allocation2] sm:$0x1] %v12_v0 }
   0x3   :  { %14 = vsyncpa [#allocation4], 0 }
   0x4   :  { %16 = vsyncpa [#allocation4 + $0x1], 0  ;;  %s1811_s26 = smov 0   ;;  %s1813_s27 = smov 0  }
   0x5   :  { %s1815_s28 = smov 0   ;;  %s1817_s29 = smov 0  }
   0x6 LB: > { %s1324_s6 = sadd.s32 4294967295, %s1763_s29   ;;  %s1325_s30 = sadd.s32 4294967294, %s1763_s29   ;;  %s1763_s29 = sphi %s1817_s29, %s2198_s29   ;;  %s1759_s28 = sphi %s1815_s28, %s2197_s28   ;;  %s1755_s27 = sphi %s1813_s27, %s2196_s27   ;;  %s1751_s26 = sphi %s1811_s26, %s2195_s26  }
   0x7   : > { %s1834_s8 = sadd.s32 1, %s1763_s29   ;;  %s181_s9 = sadd.s32 1, %s1759_s28 }
   0x8   : > { %s178_s10 = ssub.s32 %s1763_s29, %s1834_s8  ;;  %p191_p0 = scmp.ne.s32.totalorder %s1759_s28, %s1755_s27 }
   0x9   : > { %p179_p1 = scmp.eq.s32.totalorder %s178_s10, 0  ;;  %p192_p2 = scmp.eq.s32.totalorder %s1324_s6, 1 }
   0xa   : > { %p197_p3 = scmp.ne.s32.totalorder %s1755_s27, %s1751_s26  ;;  %p198_p4 = scmp.eq.s32.totalorder %s1325_s30, 1 }
   0xb   : > { %s1844_s11 = scalar_select %p179_p1, %s1759_s28, %s181_s9  }
   0xc   : > { %p1846_p5 = por %p192_p2, %p191_p0  ;;  %p1850_p6 = por %p198_p4, %p197_p3 }
   0xd   : > { %p1328_p7 = scmp.ge.s32.totalorder %s1763_s29, 1  ;;  %p243_p8 = scmp.lt.s32.totalorder %s1763_s29, 3 }
   0xf   : > { %p244_p9 = pnand %p1328_p7, %p243_p8 }
  0x10   : > { %s1862_s18 = sshll.u32 (!%p244_p9), %s1324_s6, 5 }
  0x11   : > { %247 = sbr.rel (%p244_p9) target bundleno = 765 (0x2fd), region = 48  ;;  %p276_p10 = scmp.lt.s32.totalorder (!%p244_p9), %s1862_s18, 63 }
  0x12   : > { %s1264_s22 = scalar_lea.hbm (!%p244_p9), %s2192_s7, %s1862_s18 }
  0x16   : > { %v315_v1 = vld [vmem:[%s2186_s1 + $0x8] sm:$0xff]  ;;  %v314_v2 = vld [vmem:[%s2186_s1] sm:$0xff]  ;;  %v684_v3 = vld [vmem:[%s2188_s3 + $0x38] sm:$0xff]  ;;  %s277_s25 = scalar_select %p276_p10, %s1862_s18, 63  ;;  %vm323_vm0 = vcmask 130048   ;;  %vm692_vm1 = vcmask 523264  }
  0x17   : > { %1545 = vmatprep.subr.mxu0 %v315_v1  ;;  %1597 = vmatprep.subr.mxu1 %v684_v3  ;;  %v683_v4 = vld [vmem:[%s2188_s3 + $0x30] sm:$0xff]  ;;  %v682_v5 = vld [vmem:[%s2188_s3 + $0x28] sm:$0xff]  ;;  %v681_v6 = vld [vmem:[%s2188_s3 + $0x20] sm:$0xff]  ;;  %vm1057_vm2 = vcmask 261120  }
  0x18   : > { %1546 = vmatpush3.msra.mxu0 %v315_v1  ;;  %1598 = vmatpush3.msra.mxu1 %v684_v3  ;;  %s1331_s9 = sshll.u32 %s277_s25, 3  ;;  %v680_v39 = vld [vmem:[%s2188_s3 + $0x18] sm:$0xff]  ;;  %v679_v40 = vld [vmem:[%s2188_s3 + $0x10] sm:$0xff]  ;;  %v678_v41 = vld [vmem:[%s2188_s3 + $0x8] sm:$0xff]  ;;  %s1767_s25 = smov [#allocation3]  }
  0x19   : > { %1547 = vmatprep.subr.mxu0 %v314_v2  ;;  %1599 = vmatprep.subr.mxu1 %v683_v4  ;;  %s1881_s15 = scalar_lea.vmem %s2185_s0, %s1331_s9  ;;  %v677_v42 = vld [vmem:[%s2188_s3] sm:$0xff]  ;;  %s1707_s6 = sshll.u32 %s1767_s25, 4  ;;  %s1708_s6 = int_to_ptr.vmem [resolvable:$false] %s1707_s6 }
  0x1a   : > { %1548 = vmatpush3.msra.mxu0 %v314_v2  ;;  %1600 = vmatpush3.msra.mxu1 %v683_v4  ;;  %v282_v7 = vld [vmem:[%s1881_s15] sm:$0xff]  ;;  %v283_v8 = vld [vmem:[%s1881_s15 + $0x8] sm:$0xff]  ;;  %v284_v9 = vld [vmem:[%s1881_s15 + $0x10] sm:$0xff]  ;;  %s1709_s30 = scalar_lea.vmem %s1708_s6, 64 }
  0x1b   : > { %1601 = vmatprep.subr.mxu1 %v682_v5  ;;  %1549 = vmatprep.mubr.msk.f32.mxu0 %vm323_vm0, %v282_v7  ;;  %v285_v10 = vld [vmem:[%s1881_s15 + $0x18] sm:$0xff]  ;;  %v286_v11 = vld [vmem:[%s1881_s15 + $0x20] sm:$0xff]  ;;  %v287_v12 = vld [vmem:[%s1881_s15 + $0x28] sm:$0xff] }
  0x1c   : > { %1602 = vmatpush3.msra.mxu1 %v682_v5  ;;  %1550 = vmatmul.mubr.msk.f32.vlgmr.msra.gmra.mxu0 %vm323_vm0, %v283_v8  ;;  %v288_v13 = vld [vmem:[%s1881_s15 + $0x30] sm:$0xff]  ;;  %v289_v14 = vld [vmem:[%s1881_s15 + $0x38] sm:$0xff]  ;;  %v290_v15 = vld [vmem:[%s1881_s15 + $0x40] sm:$0xff] }
  0x1d   : > { %1603 = vmatprep.subr.mxu1 %v681_v6  ;;  %1552 = vmatprep.mubr.msk.f32.mxu0 %vm323_vm0, %v284_v9  ;;  %v291_v16 = vld [vmem:[%s1881_s15 + $0x48] sm:$0xff]  ;;  %v292_v17 = vld [vmem:[%s1881_s15 + $0x50] sm:$0xff]  ;;  %v293_v18 = vld [vmem:[%s1881_s15 + $0x58] sm:$0xff] }
  0x1e   : > { %1604 = vmatpush3.msra.mxu1 %v681_v6  ;;  %v294_v19 = vld [vmem:[%s1881_s15 + $0x60] sm:$0xff]  ;;  %v295_v20 = vld [vmem:[%s1881_s15 + $0x68] sm:$0xff]  ;;  %v296_v21 = vld [vmem:[%s1881_s15 + $0x70] sm:$0xff] }
  0x1f   : > { %v297_v22 = vld [vmem:[%s1881_s15 + $0x78] sm:$0xff]  ;;  %v298_v23 = vld [vmem:[%s1881_s15 + $0x80] sm:$0xff]  ;;  %v299_v24 = vld [vmem:[%s1881_s15 + $0x88] sm:$0xff]  ;;  %1605 = vmatprep.subr.mxu1 %v680_v39 }
  0x20   : > { %1553 = vmatmul.mubr.msk.f32.gmra.mxu0 %vm323_vm0, %v285_v10  ;;  %v300_v25 = vld [vmem:[%s1881_s15 + $0x90] sm:$0xff]  ;;  %v301_v26 = vld [vmem:[%s1881_s15 + $0x98] sm:$0xff]  ;;  %v302_v27 = vld [vmem:[%s1881_s15 + $0xa0] sm:$0xff]  ;;  %1606 = vmatpush3.msra.mxu1 %v680_v39 }
  0x21   : > { %1555 = vmatprep.mubr.msk.f32.mxu0 %vm323_vm0, %v286_v11  ;;  %v303_v28 = vld [vmem:[%s1881_s15 + $0xa8] sm:$0xff]  ;;  %v304_v29 = vld [vmem:[%s1881_s15 + $0xb0] sm:$0xff]  ;;  %v305_v30 = vld [vmem:[%s1881_s15 + $0xb8] sm:$0xff]  ;;  %1607 = vmatprep.subr.mxu1 %v679_v40 }
  0x22   : > { %v306_v31 = vld [vmem:[%s1881_s15 + $0xc0] sm:$0xff]  ;;  %v307_v32 = vld [vmem:[%s1881_s15 + $0xc8] sm:$0xff]  ;;  %v308_v33 = vld [vmem:[%s1881_s15 + $0xd0] sm:$0xff]  ;;  %1608 = vmatpush3.msra.mxu1 %v679_v40 }
  0x23   : > { %v309_v34 = vld [vmem:[%s1881_s15 + $0xd8] sm:$0xff]  ;;  %v310_v35 = vld [vmem:[%s1881_s15 + $0xe0] sm:$0xff]  ;;  %v311_v36 = vld [vmem:[%s1881_s15 + $0xe8] sm:$0xff]  ;;  %1609 = vmatprep.subr.mxu1 %v678_v41 }
  0x24   : > { %1556 = vmatmul.mubr.msk.f32.gmra.mxu0 %vm323_vm0, %v287_v12  ;;  %v312_v37 = vld [vmem:[%s1881_s15 + $0xf0] sm:$0xff]  ;;  %v313_v38 = vld [vmem:[%s1881_s15 + $0xf8] sm:$0xff]  ;;  %1610 = vmatpush3.msra.mxu1 %v678_v41  ;;  %v1962_v43 = vld [vmem:[%s2187_s2] ss:$0 sm:$0xff]  ;;  %s272_s15 = sand.u32 1, %s1755_s27  }
  0x25   : > { %1558 = vmatprep.mubr.msk.f32.mxu0 %vm323_vm0, %v288_v13  ;;  %1611 = vmatprep.subr.mxu1 %v677_v42  ;;  %s1329_s16 = sshll.u32 %s272_s15, 1  ;;  %s1252_s23 = scalar_lea.sflag [#allocation4], %s272_s15 }
  0x26   : > { %1612 = vmatpush3.msra.mxu1 %v677_v42  ;;  %s274_s17 = scalar_lea.vmem [#allocation3], %s1329_s16 }
  0x27   : > { %s1266_s19 = sshll.u32 %s274_s17, 4  ;;  %s1267_s19 = int_to_ptr.vmem [resolvable:$true] %s1266_s19 }
  0x28   : > { %1559 = vmatmul.mubr.msk.f32.gmra.mxu0 %vm323_vm0, %v289_v14  ;;  %s1703_s24 = scalar_lea.vmem %s1267_s19, 32  ;;  %p1710_p0 = scmp.lt.s32.totalorder %s1267_s19, %s1708_s6 }
  0x29   : > { %1561 = vmatprep.mubr.msk.f32.mxu0 %vm323_vm0, %v290_v15  ;;  %p1704_p11 = scmp.ne.s32.totalorder %s1267_s19, %s1703_s24  ;;  %p1711_p1 = scmp.lt.s32.totalorder %s1709_s30, %s1703_s24 }
  0x2b   : > { %p1705_p12 = pnand %p1704_p11, %p1846_p5  ;;  %p1712_p2 = por %p1711_p1, %p1710_p0 }
  0x2c   : > { %1562 = vmatmul.mubr.msk.f32.gmra.mxu0 %vm323_vm0, %v291_v16 }
  0x2d   : > { %1564 = vmatprep.mubr.msk.f32.mxu0 %vm323_vm0, %v292_v17  ;;  %p1706_p13 = pneg %p1705_p12 }
  0x2f   : > { %p1713_p3 = pnand %p1712_p2, %p1706_p13 }
  0x30   : > { %1565 = vmatmul.mubr.msk.f32.gmra.mxu0 %vm323_vm0, %v293_v18 }
  0x31   : > { %1567 = vmatprep.mubr.msk.f32.mxu0 %vm323_vm0, %v294_v19 }
  0x34   : > { %1568 = vmatmul.mubr.msk.f32.gmra.mxu0 %vm323_vm0, %v295_v20 }
  0x35   : > { %1570 = vmatprep.mubr.msk.f32.mxu0 %vm323_vm0, %v296_v21 }
  0x38   : > { %1571 = vmatmul.mubr.msk.f32.gmra.mxu0 %vm323_vm0, %v297_v22 }
  0x39   : > { %1573 = vmatprep.mubr.msk.f32.mxu0 %vm323_vm0, %v298_v23 }
  0x3c   : > { %1574 = vmatmul.mubr.msk.f32.gmra.mxu0 %vm323_vm0, %v299_v24 }
  0x3d   : > { %1576 = vmatprep.mubr.msk.f32.mxu0 %vm323_vm0, %v300_v25 }
  0x40   : > { %1577 = vmatmul.mubr.msk.f32.gmra.mxu0 %vm323_vm0, %v301_v26 }
  0x41   : > { %1579 = vmatprep.mubr.msk.f32.mxu0 %vm323_vm0, %v302_v27 }
  0x44   : > { %1580 = vmatmul.mubr.msk.f32.gmra.mxu0 %vm323_vm0, %v303_v28 }
  0x45   : > { %1582 = vmatprep.mubr.msk.f32.mxu0 %vm323_vm0, %v304_v29 }
  0x48   : > { %1583 = vmatmul.mubr.msk.f32.gmra.mxu0 %vm323_vm0, %v305_v30 }
  0x49   : > { %1585 = vmatprep.mubr.msk.f32.mxu0 %vm323_vm0, %v306_v31 }
  0x4c   : > { %1586 = vmatmul.mubr.msk.f32.gmra.mxu0 %vm323_vm0, %v307_v32 }
  0x4d   : > { %1588 = vmatprep.mubr.msk.f32.mxu0 %vm323_vm0, %v308_v33 }
  0x50   : > { %1589 = vmatmul.mubr.msk.f32.gmra.mxu0 %vm323_vm0, %v309_v34 }
  0x51   : > { %1591 = vmatprep.mubr.msk.f32.mxu0 %vm323_vm0, %v310_v35 }
  0x54   : > { %1592 = vmatmul.mubr.msk.f32.gmra.mxu0 %vm323_vm0, %v311_v36 }
  0x55   : > { %1594 = vmatprep.mubr.msk.f32.mxu0 %vm323_vm0, %v312_v37 }
  0x58   : > { %1595 = vmatmul.mubr.msk.f32.gmra.mxu0 %vm323_vm0, %v313_v38 }
  0xdc   : > { %v1551_v44 = vpop.f32.mrf.mxu0 }
  0xdd   : > { %v492_v45 = vadd.f32 %v1551_v44, %v1962_v43 }
  0xde   : > { %v486_v46 = vpop.f32.mrf.mxu0 }
  0xdf   : > { %v487_v47 = vadd.f32 %v1962_v43, %v486_v46  ;;  %v646_v50 = vmax.f32 %v492_v45, 0.0 }
  0xe0   : > { %v1554_v48 = vpop.f32.mrf.mxu0 }
  0xe1   : > { %v645_v49 = vmax.f32 %v487_v47, 0.0  ;;  %v502_v51 = vadd.f32 %v1554_v48, %v1962_v43 }
  0xe2   : > { %v496_v52 = vpop.f32.mrf.mxu0 }
  0xe3   : > { %v497_v53 = vadd.f32 %v1962_v43, %v496_v52  ;;  %1613 = vmatprep.mubr.msk.f32.mxu1 %vm692_vm1, %v645_v49  ;;  %v648_v56 = vmax.f32 %v502_v51, 0.0 }
  0xe4   : > { %v1557_v54 = vpop.f32.mrf.mxu0  ;;  %1614 = vmatmul.mubr.msk.f32.vlgmr.msra.gmra.mxu1 %vm692_vm1, %v646_v50 }
  0xe5   : > { %v647_v55 = vmax.f32 %v497_v53, 0.0  ;;  %v512_v57 = vadd.f32 %v1557_v54, %v1962_v43 }
  0xe6   : > { %v506_v58 = vpop.f32.mrf.mxu0 }
  0xe7   : > { %v507_v59 = vadd.f32 %v1962_v43, %v506_v58  ;;  %1616 = vmatprep.mubr.msk.f32.mxu1 %vm692_vm1, %v647_v55  ;;  %v650_v62 = vmax.f32 %v512_v57, 0.0 }
  0xe8   : > { %v1560_v60 = vpop.f32.mrf.mxu0  ;;  %1617 = vmatmul.mubr.msk.f32.gmra.mxu1 %vm692_vm1, %v648_v56 }
  0xe9   : > { %v649_v61 = vmax.f32 %v507_v59, 0.0  ;;  %v522_v63 = vadd.f32 %v1560_v60, %v1962_v43 }
  0xea   : > { %v516_v0 = vpop.f32.mrf.mxu0 }
  0xeb   : > { %v517_v1 = vadd.f32 %v1962_v43, %v516_v0  ;;  %1619 = vmatprep.mubr.msk.f32.mxu1 %vm692_vm1, %v649_v61  ;;  %v652_v4 = vmax.f32 %v522_v63, 0.0 }
  0xec   : > { %v1563_v2 = vpop.f32.mrf.mxu0  ;;  %1620 = vmatmul.mubr.msk.f32.gmra.mxu1 %vm692_vm1, %v650_v62 }
  0xed   : > { %v651_v3 = vmax.f32 %v517_v1, 0.0  ;;  %v532_v5 = vadd.f32 %v1563_v2, %v1962_v43 }
  0xee   : > { %v526_v6 = vpop.f32.mrf.mxu0 }
  0xef   : > { %v527_v7 = vadd.f32 %v1962_v43, %v526_v6  ;;  %1622 = vmatprep.mubr.msk.f32.mxu1 %vm692_vm1, %v651_v3  ;;  %v654_v10 = vmax.f32 %v532_v5, 0.0 }
  0xf0   : > { %v1566_v8 = vpop.f32.mrf.mxu0  ;;  %1623 = vmatmul.mubr.msk.f32.gmra.mxu1 %vm692_vm1, %v652_v4 }
  0xf1   : > { %v653_v9 = vmax.f32 %v527_v7, 0.0  ;;  %v542_v11 = vadd.f32 %v1566_v8, %v1962_v43 }
  0xf2   : > { %v536_v12 = vpop.f32.mrf.mxu0 }
  0xf3   : > { %v537_v13 = vadd.f32 %v1962_v43, %v536_v12  ;;  %1625 = vmatprep.mubr.msk.f32.mxu1 %vm692_vm1, %v653_v9  ;;  %v656_v16 = vmax.f32 %v542_v11, 0.0 }
  0xf4   : > { %v1569_v14 = vpop.f32.mrf.mxu0  ;;  %1626 = vmatmul.mubr.msk.f32.gmra.mxu1 %vm692_vm1, %v654_v10 }
  0xf5   : > { %v655_v15 = vmax.f32 %v537_v13, 0.0  ;;  %v552_v17 = vadd.f32 %v1569_v14, %v1962_v43  ;;  %v2031_v13 = vld [vmem:[%s2190_s5] sm:$0x1] }
  0xf6   : > { %v546_v18 = vpop.f32.mrf.mxu0  ;;  %1543 = vmatprep.mubr.msk.f32.mxu0 %vm1057_vm2, %v2031_v13  ;;  %v1047_v14 = vld [vmem:[#allocation2] sm:$0x1] }
  0xf7   : > { %v547_v19 = vadd.f32 %v1962_v43, %v546_v18  ;;  %1628 = vmatprep.mubr.msk.f32.mxu1 %vm692_vm1, %v655_v15  ;;  %v658_v22 = vmax.f32 %v552_v17, 0.0 }
  0xf8   : > { %v1572_v20 = vpop.f32.mrf.mxu0  ;;  %1629 = vmatmul.mubr.msk.f32.gmra.mxu1 %vm692_vm1, %v656_v16  ;;  %v1765_v16 = vmov 0  }
  0xf9   : > { %v657_v21 = vmax.f32 %v547_v19, 0.0  ;;  %v562_v23 = vadd.f32 %v1572_v20, %v1962_v43  ;;  %1702 = vset.pattern.permute.xlu0 %v1765_v16 }
  0xfa   : > { %v556_v24 = vpop.f32.mrf.mxu0  ;;  %1050 = vperm.xlu0 %1702, %v1047_v14  }
  0xfb   : > { %v557_v25 = vadd.f32 %v1962_v43, %v556_v24  ;;  %1631 = vmatprep.mubr.msk.f32.mxu1 %vm692_vm1, %v657_v21  ;;  %v660_v28 = vmax.f32 %v562_v23, 0.0 }
  0xfc   : > { %v1575_v26 = vpop.f32.mrf.mxu0  ;;  %1632 = vmatmul.mubr.msk.f32.gmra.mxu1 %vm692_vm1, %v658_v22 }
  0xfd   : > { %v659_v27 = vmax.f32 %v557_v25, 0.0  ;;  %v572_v29 = vadd.f32 %v1575_v26, %v1962_v43 }
  0xfe   : > { %v566_v30 = vpop.f32.mrf.mxu0 }
  0xff   : > { %v567_v31 = vadd.f32 %v1962_v43, %v566_v30  ;;  %1634 = vmatprep.mubr.msk.f32.mxu1 %vm692_vm1, %v659_v27  ;;  %v662_v34 = vmax.f32 %v572_v29, 0.0 }
 0x100   : > { %v1578_v32 = vpop.f32.mrf.mxu0  ;;  %1635 = vmatmul.mubr.msk.f32.gmra.mxu1 %vm692_vm1, %v660_v28 }
 0x101   : > { %v661_v33 = vmax.f32 %v567_v31, 0.0  ;;  %v582_v35 = vadd.f32 %v1578_v32, %v1962_v43 }
 0x102   : > { %v576_v36 = vpop.f32.mrf.mxu0 }
 0x103   : > { %v577_v37 = vadd.f32 %v1962_v43, %v576_v36  ;;  %1637 = vmatprep.mubr.msk.f32.mxu1 %vm692_vm1, %v661_v33  ;;  %v664_v40 = vmax.f32 %v582_v35, 0.0 }
 0x104   : > { %v1581_v38 = vpop.f32.mrf.mxu0  ;;  %1638 = vmatmul.mubr.msk.f32.gmra.mxu1 %vm692_vm1, %v662_v34 }
 0x105   : > { %v663_v39 = vmax.f32 %v577_v37, 0.0  ;;  %v592_v41 = vadd.f32 %v1581_v38, %v1962_v43 }
 0x106   : > { %v586_v42 = vpop.f32.mrf.mxu0 }
 0x107   : > { %v587_v44 = vadd.f32 %v1962_v43, %v586_v42  ;;  %1640 = vmatprep.mubr.msk.f32.mxu1 %vm692_vm1, %v663_v39  ;;  %v666_v47 = vmax.f32 %v592_v41, 0.0 }
 0x108   : > { %v1584_v45 = vpop.f32.mrf.mxu0  ;;  %1641 = vmatmul.mubr.msk.f32.gmra.mxu1 %vm692_vm1, %v664_v40 }
 0x109   : > { %v665_v46 = vmax.f32 %v587_v44, 0.0  ;;  %v602_v48 = vadd.f32 %v1584_v45, %v1962_v43 }
 0x10a   : > { %v596_v49 = vpop.f32.mrf.mxu0 }
 0x10b   : > { %v597_v50 = vadd.f32 %v1962_v43, %v596_v49  ;;  %1643 = vmatprep.mubr.msk.f32.mxu1 %vm692_vm1, %v665_v46  ;;  %v668_v53 = vmax.f32 %v602_v48, 0.0  ;;  %v2068_v46 = vld [vmem:[%s2189_s4] ss:$0 sm:$0xff] }
 0x10c   : > { %v1587_v51 = vpop.f32.mrf.mxu0  ;;  %1644 = vmatmul.mubr.msk.f32.gmra.mxu1 %vm692_vm1, %v666_v47 }
 0x10d   : > { %v667_v52 = vmax.f32 %v597_v50, 0.0  ;;  %v612_v54 = vadd.f32 %v1587_v51, %v1962_v43 }
 0x10e   : > { %v606_v55 = vpop.f32.mrf.mxu0 }
 0x10f   : > { %v607_v56 = vadd.f32 %v1962_v43, %v606_v55  ;;  %1646 = vmatprep.mubr.msk.f32.mxu1 %vm692_vm1, %v667_v52  ;;  %v670_v59 = vmax.f32 %v612_v54, 0.0 }
 0x110   : > { %v1590_v57 = vpop.f32.mrf.mxu0  ;;  %1647 = vmatmul.mubr.msk.f32.gmra.mxu1 %vm692_vm1, %v668_v53 }
 0x111   : > { %v669_v58 = vmax.f32 %v607_v56, 0.0  ;;  %v622_v60 = vadd.f32 %v1590_v57, %v1962_v43 }
 0x112   : > { %v616_v61 = vpop.f32.mrf.mxu0 }
 0x113   : > { %v617_v62 = vadd.f32 %v1962_v43, %v616_v61  ;;  %1649 = vmatprep.mubr.msk.f32.mxu1 %vm692_vm1, %v669_v58  ;;  %v672_v1 = vmax.f32 %v622_v60, 0.0 }
 0x114   : > { %v1593_v63 = vpop.f32.mrf.mxu0  ;;  %1650 = vmatmul.mubr.msk.f32.gmra.mxu1 %vm692_vm1, %v670_v59 }
 0x115   : > { %v671_v0 = vmax.f32 %v617_v62, 0.0  ;;  %v632_v2 = vadd.f32 %v1593_v63, %v1962_v43 }
 0x116   : > { %v626_v3 = vpop.f32.mrf.mxu0 }
 0x117   : > { %v627_v4 = vadd.f32 %v1962_v43, %v626_v3  ;;  %1652 = vmatprep.mubr.msk.f32.mxu1 %vm692_vm1, %v671_v0  ;;  %v674_v7 = vmax.f32 %v632_v2, 0.0 }
 0x118   : > { %v1596_v5 = vpop.f32.mrf.mxu0  ;;  %1653 = vmatmul.mubr.msk.f32.gmra.mxu1 %vm692_vm1, %v672_v1 }
 0x119   : > { %v673_v6 = vmax.f32 %v627_v4, 0.0  ;;  %v642_v8 = vadd.f32 %v1596_v5, %v1962_v43 }
 0x11a   : > { %v636_v9 = vpop.f32.mrf.mxu0 }
 0x11b   : > { %v637_v10 = vadd.f32 %v1962_v43, %v636_v9  ;;  %1655 = vmatprep.mubr.msk.f32.mxu1 %vm692_vm1, %v673_v6  ;;  %v676_v12 = vmax.f32 %v642_v8, 0.0 }
 0x11c   : > { %1656 = vmatmul.mubr.msk.f32.gmra.mxu1 %vm692_vm1, %v674_v7 }
 0x11d   : > { %v675_v11 = vmax.f32 %v637_v10, 0.0 }
 0x11f   : > { %1658 = vmatprep.mubr.msk.f32.mxu1 %vm692_vm1, %v675_v11 }
 0x120   : > { %1659 = vmatmul.mubr.msk.f32.gmra.mxu1 %vm692_vm1, %v676_v12 }
 0x1a4   : > { %v2035_v43 = vpop.f32.mrf.mxu1 }
 0x1a6   : > { %v2037_v15 = vpop.f32.mrf.mxu1 }
 0x1a8   : > { %v2039_v17 = vpop.f32.mrf.mxu1 }
 0x1aa   : > { %v2041_v18 = vpop.f32.mrf.mxu1 }
 0x1ac   : > { %v2043_v19 = vpop.f32.mrf.mxu1 }
 0x1ae   : > { %v2045_v20 = vpop.f32.mrf.mxu1 }
 0x1b0   : > { %v2047_v21 = vpop.f32.mrf.mxu1 }
 0x1b2   : > { %v2049_v22 = vpop.f32.mrf.mxu1 }
 0x1b4   : > { %v1627_v23 = vpop.f32.mrf.mxu1 }
 0x1b5   : > { %v901_v9 = vadd.f32 %v1627_v23, %v2068_v46  ;;  %v891_v23 = vadd.f32 %v2047_v21, %v2068_v46  ;;  %v881_v21 = vadd.f32 %v2043_v19, %v2068_v46  ;;  %v871_v19 = vadd.f32 %v2039_v17, %v2068_v46 }
 0x1b6   : > { %v2051_v24 = vpop.f32.mrf.mxu1  ;;  %v861_v17 = vadd.f32 %v2035_v43, %v2068_v46 }
 0x1b7   : > { %v1023_v14 = vmax.f32 %v901_v9, 0.0  ;;  %v896_v16 = vadd.f32 %v2068_v46, %v2051_v24  ;;  %v886_v24 = vadd.f32 %v2068_v46, %v2049_v22  ;;  %v1019_v22 = vmax.f32 %v881_v21, 0.0 }
 0x1b8   : > { %v1630_v25 = vpop.f32.mrf.mxu1 }
 0x1b9   : > { %v911_v1 = vadd.f32 %v1630_v25, %v2068_v46 }
 0x1ba   : > { %v905_v26 = vpop.f32.mrf.mxu1 }
 0x1bb   : > { %v1025_v5 = vmax.f32 %v911_v1, 0.0  ;;  %v906_v6 = vadd.f32 %v2068_v46, %v905_v26 }
 0x1bc   : > { %v1633_v27 = vpop.f32.mrf.mxu1 }
 0x1bd   : > { %v921_v57 = vadd.f32 %v1633_v27, %v2068_v46  ;;  %v1024_v10 = vmax.f32 %v906_v6, 0.0  ;;  %v1022_v27 = vmax.f32 %v896_v16, 0.0 }
 0x1be   : > { %v915_v28 = vpop.f32.mrf.mxu1 }
 0x1bf   : > { %v1027_v61 = vmax.f32 %v921_v57, 0.0  ;;  %v916_v62 = vadd.f32 %v2068_v46, %v915_v28  ;;  %v1051_v57 = vpop.permute.xlu0 %1050 }
 0x1c0   : > { %v1636_v29 = vpop.f32.mrf.mxu1 }
 0x1c1   : > { %v931_v47 = vadd.f32 %v1636_v29, %v2068_v46  ;;  %v1026_v2 = vmax.f32 %v916_v62, 0.0 }
 0x1c2   : > { %v925_v30 = vpop.f32.mrf.mxu1 }
 0x1c3   : > { %v1029_v53 = vmax.f32 %v931_v47, 0.0  ;;  %v926_v54 = vadd.f32 %v2068_v46, %v925_v30  ;;  %v1021_v30 = vmax.f32 %v891_v23, 0.0 }
 0x1c4   : > { %v2053_v31 = vpop.f32.mrf.mxu1 }
 0x1c5   : > { %v1028_v58 = vmax.f32 %v926_v54, 0.0 }
 0x1c6   : > { %v2055_v32 = vpop.f32.mrf.mxu1 }
 0x1c8   : > { %v2057_v33 = vpop.f32.mrf.mxu1 }
 0x1ca   : > { %v2059_v34 = vpop.f32.mrf.mxu1 }
 0x1cb   : > { %v946_v47 = vadd.f32 %v2068_v46, %v2059_v34 }
 0x1cc   : > { %v2061_v35 = vpop.f32.mrf.mxu1 }
 0x1ce   : > { %v2063_v36 = vpop.f32.mrf.mxu1 }
 0x1d0   : > { %v1648_v37 = vpop.f32.mrf.mxu1 }
 0x1d1   : > { %v971_v25 = vadd.f32 %v1648_v37, %v2068_v46  ;;  %v961_v37 = vadd.f32 %v2061_v35, %v2068_v46  ;;  %v876_v35 = vadd.f32 %v2068_v46, %v2045_v20  ;;  %v1017_v20 = vmax.f32 %v871_v19, 0.0 }
 0x1d2   : > { %v965_v38 = vpop.f32.mrf.mxu1 }
 0x1d3   : > { %v1037_v28 = vmax.f32 %v971_v25, 0.0  ;;  %v966_v29 = vadd.f32 %v2068_v46, %v965_v38  ;;  %v1020_v38 = vmax.f32 %v886_v24, 0.0 }
 0x1d4   : > { %v1651_v39 = vpop.f32.mrf.mxu1 }
 0x1d5   : > { %v981_v7 = vadd.f32 %v1651_v39, %v2068_v46  ;;  %v1036_v39 = vmax.f32 %v966_v29, 0.0 }
 0x1d6   : > { %v975_v40 = vpop.f32.mrf.mxu1 }
 0x1d7   : > { %v1039_v11 = vmax.f32 %v981_v7, 0.0  ;;  %v976_v12 = vadd.f32 %v2068_v46, %v975_v40  ;;  %v1035_v40 = vmax.f32 %v961_v37, 0.0 }
 0x1d8   : > { %v1654_v41 = vpop.f32.mrf.mxu1 }
 0x1d9   : > { %v991_v63 = vadd.f32 %v1654_v41, %v2068_v46  ;;  %v1038_v26 = vmax.f32 %v976_v12, 0.0  ;;  %v956_v41 = vadd.f32 %v2068_v46, %v2063_v36  ;;  %v1018_v36 = vmax.f32 %v876_v35, 0.0 }
 0x1da   : > { %v985_v42 = vpop.f32.mrf.mxu1 }
 0x1db   : > { %v1041_v3 = vmax.f32 %v991_v63, 0.0  ;;  %v986_v4 = vadd.f32 %v2068_v46, %v985_v42  ;;  %v951_v42 = vadd.f32 %v2057_v33, %v2068_v46  ;;  %v866_v33 = vadd.f32 %v2068_v46, %v2041_v18 }
 0x1dc   : > { %v1657_v44 = vpop.f32.mrf.mxu1  ;;  %v1015_v18 = vmax.f32 %v861_v17, 0.0 }
 0x1dd   : > { %v1001_v55 = vadd.f32 %v1657_v44, %v2068_v46  ;;  %v1040_v8 = vmax.f32 %v986_v4, 0.0  ;;  %v1034_v44 = vmax.f32 %v956_v41, 0.0  ;;  %v1016_v34 = vmax.f32 %v866_v33, 0.0 }
 0x1de   : > { %v995_v45 = vpop.f32.mrf.mxu1 }
 0x1df   : > { %v1043_v59 = vmax.f32 %v1001_v55, 0.0  ;;  %v996_v60 = vadd.f32 %v2068_v46, %v995_v45  ;;  %v1033_v45 = vmax.f32 %v951_v42, 0.0  ;;  %v1766_v55 = vmov 1966171168  }
 0x1e0   : > { %v1660_v48 = vpop.f32.mrf.mxu1 }
 0x1e1   : > { %v1011_v49 = vadd.f32 %v1660_v48, %v2068_v46  ;;  %v1042_v0 = vmax.f32 %v996_v60, 0.0  ;;  %v941_v48 = vadd.f32 %v2053_v31, %v2068_v46  ;;  %v856_v31 = vadd.f32 %v2068_v46, %v2037_v15 }
 0x1e2   : > { %v1005_v50 = vpop.f32.mrf.mxu1 }
 0x1e3   : > { %v1045_v51 = vmax.f32 %v1011_v49, 0.0  ;;  %v1006_v52 = vadd.f32 %v2068_v46, %v1005_v50  ;;  %v1032_v49 = vmax.f32 %v946_v47, 0.0  ;;  %v1031_v50 = vmax.f32 %v941_v48, 0.0 }
 0x1e4   : > { %v1014_v43 = vmax.f32 %v856_v31, 0.0 }
 0x1e5   : > { %v1044_v56 = vmax.f32 %v1006_v52, 0.0  ;;  %1511 = vmatprep.subr.msk.mxu0 %vm1057_vm2, %v1045_v51  ;;  %v936_v51 = vadd.f32 %v2068_v46, %v2055_v32  ;;  %v1053_v32 = vlaneseq }
 0x1e6   : > { %1512 = vmatpush3.xpose.msk.msra.mxu0 %vm1057_vm2, %v1029_v53 }
 0x1e7   : > { %1513 = vmatprep.subr.msk.mxu0 %vm1057_vm2, %v1044_v56  ;;  %v1030_v52 = vmax.f32 %v936_v51, 0.0  ;;  %v1054_v53 = vshrl.u32 %v1053_v32, 7  ;;  %v1232_v56 = vunpack.c.l.s4 %v1766_v55  ;;  %vm1248_vm3 = vcmp.lt.s32.totalorder %v1053_v32, 256 }
 0x1e9   : > { %v1055_v54 = vsub.s32 0, %v1054_v53  ;;  %v1233_v46 = vunpack.c.0.s8 %v1232_v56 }
 0x1ea   : > { %1514 = vmatpush3.xpose.msk.msra.mxu0 %vm1057_vm2, %v1028_v58 }
 0x1eb   : > { %1515 = vmatprep.subr.msk.mxu0 %vm1057_vm2, %v1043_v59  ;;  %v1056_v15 = vrot.slane %v1051_v57, %v1055_v54  ;;  %v1236_v62 = vsub.s32 %v1233_v46, %v1054_v53 }
 0x1ee   : > { %1516 = vmatpush3.xpose.msk.msra.mxu0 %vm1057_vm2, %v1027_v61 }
 0x1ef   : > { %1517 = vmatprep.subr.msk.mxu0 %vm1057_vm2, %v1042_v0 }
 0x1f2   : > { %1518 = vmatpush3.xpose.msk.msra.mxu0 %vm1057_vm2, %v1026_v2 }
 0x1f3   : > { %1519 = vmatprep.subr.msk.mxu0 %vm1057_vm2, %v1041_v3 }
 0x1f6   : > { %1520 = vmatpush3.xpose.msk.msra.mxu0 %vm1057_vm2, %v1025_v5 }
 0x1f7   : > { %1521 = vmatprep.subr.msk.mxu0 %vm1057_vm2, %v1040_v8 }
 0x1fa   : > { %1522 = vmatpush3.xpose.msk.msra.mxu0 %vm1057_vm2, %v1024_v10 }
 0x1fb   : > { %1523 = vmatprep.subr.msk.mxu0 %vm1057_vm2, %v1039_v11 }
 0x1fe   : > { %1524 = vmatpush3.xpose.msk.msra.mxu0 %vm1057_vm2, %v1023_v14 }
 0x1ff   : > { %1525 = vmatprep.subr.msk.mxu0 %vm1057_vm2, %v1038_v26 }
 0x202   : > { %1526 = vmatpush3.xpose.msk.msra.mxu0 %vm1057_vm2, %v1022_v27 }
 0x203   : > { %1527 = vmatprep.subr.msk.mxu0 %vm1057_vm2, %v1037_v28 }
 0x206   : > { %1528 = vmatpush3.xpose.msk.msra.mxu0 %vm1057_vm2, %v1021_v30 }
 0x207   : > { %1529 = vmatprep.subr.msk.mxu0 %vm1057_vm2, %v1036_v39 }
 0x20a   : > { %1530 = vmatpush3.xpose.msk.msra.mxu0 %vm1057_vm2, %v1020_v38 }
 0x20b   : > { %1531 = vmatprep.subr.msk.mxu0 %vm1057_vm2, %v1035_v40 }
 0x20e   : > { %1532 = vmatpush3.xpose.msk.msra.mxu0 %vm1057_vm2, %v1019_v22 }
 0x20f   : > { %1533 = vmatprep.subr.msk.mxu0 %vm1057_vm2, %v1034_v44 }
 0x212   : > { %1534 = vmatpush3.xpose.msk.msra.mxu0 %vm1057_vm2, %v1018_v36 }
 0x213   : > { %1535 = vmatprep.subr.msk.mxu0 %vm1057_vm2, %v1033_v45 }
 0x216   : > { %1536 = vmatpush3.xpose.msk.msra.mxu0 %vm1057_vm2, %v1017_v20 }
 0x217   : > { %1537 = vmatprep.subr.msk.mxu0 %vm1057_vm2, %v1032_v49 }
 0x21a   : > { %1538 = vmatpush3.xpose.msk.msra.mxu0 %vm1057_vm2, %v1016_v34 }
 0x21b   : > { %1539 = vmatprep.subr.msk.mxu0 %vm1057_vm2, %v1031_v50 }
 0x21e   : > { %1540 = vmatpush3.xpose.msk.msra.mxu0 %vm1057_vm2, %v1015_v18 }
 0x21f   : > { %1541 = vmatprep.subr.msk.mxu0 %vm1057_vm2, %v1030_v52 }
 0x222   : > { %1542 = vmatpush3.xpose.msk.msra.mxu0 %vm1057_vm2, %v1014_v43 }
 0x225   : > { %1544 = vmatmul.mubr.msk.f32.vlgmr.msra.gmra.mxu0 %vm1057_vm2, %v2031_v13 }
 0x2e5   : > { %v1223_v58 = vpop.f32.mrf.mxu0 }
 0x2e6   : > { %v1224_v60 = vadd.f32 %v1223_v58, %v1056_v15 }
 0x2e7   : > { %v1225_v59 = vpop.f32.mrf.mxu0 }
 0x2e8   : > { %v1226_v61 = vadd.f32 %v1225_v59, %v1056_v15 }
 0x2ea   : > { %v1230_v63 = vcombine.low %v1224_v60, %v1226_v61 }
 0x2ec   : > { %v1237_v13 = vrot.slane %v1230_v63, %v1236_v62 }
 0x2ee   : > { %v1244_v0 = vrot.slane %v1237_v13, %v1236_v62 }
 0x2f0   : > { %1250 = vst.msk [vmem:[%s274_s17] sm:$0x3] %vm1248_vm3, %v1244_v0 }
 0x2f1   : > { %1716 = shalt.err (!%p1713_p3)
}
 0x2f2   : > { %s1717_s9 = scalar_lea.hbm %s1264_s22, 32  ;;  %s1721_s14 = scalar_lea.hbm %s2192_s7, 64 }
 0x2f3   : > { %p1718_p4 = scmp.ne.s32.totalorder %s1264_s22, %s1717_s9  ;;  %p1722_p9 = scmp.lt.s32.totalorder %s1264_s22, %s2192_s7 }
 0x2f4   : > { %p1723_p10 = scmp.lt.s32.totalorder %s1721_s14, %s1717_s9 }
 0x2f5   : > { %p1719_p7 = pnand %p1718_p4, %p1846_p5 }
 0x2f6   : > { %p1724_p11 = por %p1723_p10, %p1722_p9 }
 0x2f7   : > { %p1720_p8 = pneg %p1719_p7 }
 0x2f9   : > { %p1725_p12 = pnand %p1724_p11, %p1720_p8 }
 0x2fb   : > { %1728 = shalt.err (!%p1725_p12)
}
 0x2fc   : > { %1661 = dma.vmem_to_hbm [thread:$0]  (%p1846_p5), %s1267_s19, 32, %s1264_s22, %s1252_s23  }
 0x2fd PF: > { %p1667_p13 = scmp.ge.s32.totalorder %s1763_s29, 2  ;;  %s1278_s17 = sand.u32 1, %s1751_s26  }
 0x2fe   : > { %s1279_s20 = scalar_lea.sflag [#allocation4], %s1278_s17 }
 0x2ff   : > { %p1664_p0 = pnand %p1667_p13, %p1850_p6 }
 0x301   : > { %p1665_p1 = pneg %p1664_p0 }
 0x303   : > { %1746 = dma.done.wait (%p1665_p1), %s1279_s20, 32  }
 0x304   : > { %1748 = vsyncadd (%p1665_p1), %s1279_s20, 4294967264  ;;  %p19_p2 = scmp.ge.s32.totalorder %s1834_s8, 4   ;;  %s2195_s26 = smov %s1755_s27 }
 0x305   : > { %s2196_s27 = smov %s1759_s28  ;;  %s2197_s28 = smov %s1844_s11 }
 0x306   : > { %s2198_s29 = smov %s1834_s8  ;;  %21 = sbr.rel (!%p19_p2) target bundleno = 6 (0x6), region = 83 }
 0x30b   :  { %1284 = vsyncpa [#allocation4], 1 }
 0x30c   :  { %1286 = vsyncpa [#allocation4 + $0x1], 1 }

</bundles_post_ra>
